<compile_context>
chip_gen: v7x
topology: tpu7x:2x2x1
jax: 0.10.0
libtpu: 0.0.40
codegen_flags: <defaults>
</compile_context>

<pallas_src>
import functools

import jax
import jax.numpy as jnp
from jax.experimental import pallas as pl
from jax.experimental.pallas import tpu as pltpu

LN_EPS = 1e-5  # PyTorch nn.LayerNorm default


def _round_up(a, m):
    return ((a + m - 1) // m) * m


def _cdiv(a, b):
    return (a + b - 1) // b


def _vmem_budget_bytes():
    """~75% of physical VMEM (96 MiB on v5e/v6e, 48 MiB on v7x).

    The exception fallback is 48 MiB: safe even on v7x, whose physical VMEM is
    only 64 MiB (a 64 MiB scoped limit there would leave zero headroom).
    """
    try:
        cap = pltpu.get_tpu_info().vmem_capacity_bytes
        return int(cap * 3 // 4)
    except Exception:
        return 48 * 1024 * 1024


# ---------------------------------------------------------------------------
# Kernel A: resident-W path (preferred).  1-D grid over row tiles; W's
# index_map is constant so it is DMA'd into VMEM once and stays resident.
# ---------------------------------------------------------------------------
def _prenorm_resident_kernel(x_ref, gamma_ref, beta_ref, w_ref, b_ref, o_ref,
                             *, d_true, mm_dtype):
    x = x_ref[...].astype(jnp.float32)                      # (tm, d_pad)
    inv_d = 1.0 / d_true
    # Single-pass mean / E[x^2].  Padded feature lanes of x are zero, so plain
    # sums are exact; gamma/beta padded lanes are zero, so the padded lanes of
    # y come out exactly zero (no iota/where masking needed).
    mean = jnp.sum(x, axis=-1, keepdims=True) * inv_d
    ex2 = jnp.sum(x * x, axis=-1, keepdims=True) * inv_d
    # max(.,0) guards f32 cancellation (and garbage rows of a ragged last row
    # tile, whose outputs are dropped by the masked store anyway).
    var = jnp.maximum(ex2 - mean * mean, 0.0)
    xn = (x - mean) * jax.lax.rsqrt(var + LN_EPS)
    y = (xn * gamma_ref[...].astype(jnp.float32)
         + beta_ref[...].astype(jnp.float32))
    # fn = Linear: MXU matmul in mm_dtype (bf16 by default), f32 accumulation.
    out = jnp.dot(y.astype(mm_dtype), w_ref[...],
                  preferred_element_type=jnp.float32)
    out = out + b_ref[...].astype(jnp.float32)
    o_ref[...] = out.astype(o_ref.dtype)


# ---------------------------------------------------------------------------
# Kernel B: column-tiled fallback for large D (W does not fit VMEM).
# 2-D grid (row tiles x W column tiles).  LayerNorm is computed ONCE per row
# tile (at j == 0, f32 math) and cached in VMEM scratch in the matmul dtype.
# CORRECTNESS INVARIANT: the column axis j MUST stay the last (innermost,
# sequential) grid axis and be marked "arbitrary"; reordering the grid axes or
# marking j "parallel" would silently reuse a stale y_ref.
# ---------------------------------------------------------------------------
def _prenorm_coltiled_kernel(x_ref, gamma_ref, beta_ref, w_ref, b_ref, o_ref,
                             y_ref, *, d_true):
    j = pl.program_id(1)

    @pl.when(j == 0)
    def _layernorm():
        x = x_ref[...].astype(jnp.float32)                  # (tm, d_pad)
        inv_d = 1.0 / d_true
        mean = jnp.sum(x, axis=-1, keepdims=True) * inv_d
        ex2 = jnp.sum(x * x, axis=-1, keepdims=True) * inv_d
        var = jnp.maximum(ex2 - mean * mean, 0.0)
        xn = (x - mean) * jax.lax.rsqrt(var + LN_EPS)
        y = (xn * gamma_ref[...].astype(jnp.float32)
             + beta_ref[...].astype(jnp.float32))
        y_ref[...] = y.astype(y_ref.dtype)

    out = jnp.dot(y_ref[...], w_ref[...], preferred_element_type=jnp.float32)
    out = out + b_ref[...].astype(jnp.float32)
    o_ref[...] = out.astype(o_ref.dtype)


def prenorm_linear(x, gamma, beta, w, b, *, tm=None, tn=None,
                   allow_bf16_matmul=True, vmem_limit_bytes=None,
                   _force_column_tiled=False):
    """PreNorm with fn = Linear(D, D_out).  x: (B, N, D) -> (B, N, D_out)."""
    B, N, D = x.shape
    M = B * N
    D_in, D_out = w.shape
    assert D_in == D, "Linear weight must be (D, D_out)"

    out_dtype = x.dtype
    x_bytes = jnp.dtype(x.dtype).itemsize
    out_bytes = jnp.dtype(out_dtype).itemsize

    # MXU dtype: bf16 unless disabled.  f32 matmul is 2-4x slower on v6e/v7x
    # and not native on v5e's MXU; the LN math stays f32 either way.
    mm_dtype = jnp.bfloat16 if allow_bf16_matmul else w.dtype
    w_mm = w if w.dtype == jnp.dtype(mm_dtype) else w.astype(mm_dtype)
    w_bytes = jnp.dtype(mm_dtype).itemsize

    if vmem_limit_bytes is None:
        vmem_limit_bytes = _vmem_budget_bytes()
    budget = vmem_limit_bytes

    # ---- feature padding: only when the lane axis is not already 128-dense --
    d_pad = _round_up(D, 128)
    x2 = x.reshape(M, D)
    gamma2 = gamma.reshape(1, D)
    beta2 = beta.reshape(1, D)
    if d_pad != D:
        x2 = jnp.pad(x2, ((0, 0), (0, d_pad - D)))
        gamma2 = jnp.pad(gamma2, ((0, 0), (0, d_pad - D)))
        beta2 = jnp.pad(beta2, ((0, 0), (0, d_pad - D)))

    # ---- row tiling: no padding/cropping of M.  The grid uses cdiv and the
    # ragged last row tile is handled by Pallas (OOB reads affect only their
    # own rows -- LN and the matmul are row-independent -- and OOB output rows
    # are dropped by the masked store).
    m_r = _round_up(M, 8)

    def _clamp_rows(t):
        t = max(8, _round_up(min(max(t, 8), m_r), 8))
        # Keep >= 2 row tiles whenever possible so the "parallel" row axis can
        # feed both v7x TensorCores (and megacore on v5e/v6e).
        if m_r >= 16:
            t = min(t, _round_up(_cdiv(M, 2), 8))
        return t

    slop = 8 * d_pad * 4 + 4 * max(D_out, d_pad) * 4  # gamma/beta/bias buffers

    # ------------------- path 1: resident W (preferred) ----------------------
    def _resident_fits(t):
        return (2 * t * d_pad * x_bytes            # x tile, double-buffered
                + 2 * d_pad * D_out * w_bytes      # W (counted 2x, conservative)
                + 2 * t * D_out * out_bytes        # out tile, double-buffered
                + slop) <= budget

    tm_res = None
    if not _force_column_tiled:
        tm_res_req = 256 if tm is None else tm
        for cand in dict.fromkeys([_clamp_rows(tm_res_req), _clamp_rows(256),
                                   _clamp_rows(128), 8]):
            if _resident_fits(cand):
                tm_res = cand
                break

    if tm_res is not None:
        tm_ = tm_res
        w2 = w_mm if d_pad == D else jnp.pad(w_mm, ((0, d_pad - D), (0, 0)))
        b2 = b.reshape(1, D_out)
        kernel = functools.partial(_prenorm_resident_kernel, d_true=D,
                                   mm_dtype=mm_dtype)
        out2 = pl.pallas_call(
            kernel,
            out_shape=jax.ShapeDtypeStruct((M, D_out), out_dtype),
            grid_spec=pltpu.PrefetchScalarGridSpec(
                num_scalar_prefetch=0,
                grid=(_cdiv(M, tm_),),
                in_specs=[
                    pl.BlockSpec((tm_, d_pad), lambda i: (i, 0)),    # x rows
                    pl.BlockSpec((1, d_pad), lambda i: (0, 0)),      # gamma
                    pl.BlockSpec((1, d_pad), lambda i: (0, 0)),      # beta
                    # Constant index_map -> W is DMA'd once and stays resident.
                    pl.BlockSpec((d_pad, D_out), lambda i: (0, 0)),  # W
                    pl.BlockSpec((1, D_out), lambda i: (0, 0)),      # bias
                ],
                out_specs=pl.BlockSpec((tm_, D_out), lambda i: (i, 0)),
            ),
            compiler_params=pltpu.CompilerParams(
                dimension_semantics=("parallel",),
                vmem_limit_bytes=vmem_limit_bytes,
            ),
        )(x2, gamma2, beta2, w2, b2)
        return out2.reshape(B, N, D_out)

    # ------------------- path 2: column-tiled W (large D) --------------------
    n_pad = _round_up(D_out, 128)
    tn_req = 512 if tn is None else tn
    tn_req = max(128, _round_up(min(tn_req, n_pad), 128))
    # tn: multiples of 128 that divide n_pad (no dead MXU columns / dead W DMA).
    tn_cands = [t for t in range(n_pad, 0, -128)
                if n_pad % t == 0 and t <= tn_req] or [128]

    def _tiled_fits(t, n):
        return (2 * t * d_pad * x_bytes            # x tile, double-buffered
                + 2 * d_pad * n * w_bytes          # W column tile, 2x
                + 2 * t * n * out_bytes            # out tile, 2x
                + t * d_pad * w_bytes              # cached LN(x) scratch
                + slop) <= budget

    tm_til_req = 512 if tm is None else tm         # AI ~ tm when W is streamed
    tm_ = tn_ = None
    for tc in dict.fromkeys([_clamp_rows(tm_til_req), _clamp_rows(512),
                             _clamp_rows(256), _clamp_rows(128),
                             _clamp_rows(64), 8]):
        for nc in tn_cands:
            if _tiled_fits(tc, nc):
                tm_, tn_ = tc, nc
                break
        if tm_ is not None:
            break
    if tm_ is None:
        tm_, tn_ = 8, 128  # last resort

    w2 = w_mm
    if d_pad != D or n_pad != D_out:
        w2 = jnp.pad(w_mm, ((0, d_pad - D), (0, n_pad - D_out)))
    b2 = b.reshape(1, D_out)
    if n_pad != D_out:
        b2 = jnp.pad(b2, ((0, 0), (0, n_pad - D_out)))

    kernel = functools.partial(_prenorm_coltiled_kernel, d_true=D)
    out2 = pl.pallas_call(
        kernel,
        out_shape=jax.ShapeDtypeStruct((M, n_pad), out_dtype),
        grid_spec=pltpu.PrefetchScalarGridSpec(
            num_scalar_prefetch=0,
            grid=(_cdiv(M, tm_), n_pad // tn_),
            in_specs=[
                # x row tile: block index constant across j -> fetched once / i.
                pl.BlockSpec((tm_, d_pad), lambda i, j: (i, 0)),
                pl.BlockSpec((1, d_pad), lambda i, j: (0, 0)),    # gamma
                pl.BlockSpec((1, d_pad), lambda i, j: (0, 0)),    # beta
                pl.BlockSpec((d_pad, tn_), lambda i, j: (0, j)),  # W column tile
                pl.BlockSpec((1, tn_), lambda i, j: (0, j)),      # bias tile
            ],
            out_specs=pl.BlockSpec((tm_, tn_), lambda i, j: (i, j)),
            # Cached LayerNorm(x) row tile, stored in the matmul dtype.
            scratch_shapes=[pltpu.VMEM((tm_, d_pad), mm_dtype)],
        ),
        compiler_params=pltpu.CompilerParams(
            # rows: megacore/2-TC parallel; the column sweep MUST stay the
            # innermost, sequential ("arbitrary") axis so the LN cache written
            # at j == 0 is valid for all later j.
            dimension_semantics=("parallel", "arbitrary"),
            vmem_limit_bytes=vmem_limit_bytes,
        ),
    )(x2, gamma2, beta2, w2, b2)

    if n_pad != D_out:
        out2 = out2[:, :D_out]
    return out2.reshape(B, N, D_out)


def reference(x, gamma, beta, w, b):
    xf = x.astype(jnp.float32)
    mean = jnp.mean(xf, axis=-1, keepdims=True)
    var = jnp.mean((xf - mean) ** 2, axis=-1, keepdims=True)
    y = (xf - mean) * jax.lax.rsqrt(var + LN_EPS) * gamma + beta
    out = jnp.dot(y, w, precision=jax.lax.Precision.HIGHEST) + b
    return out.astype(x.dtype)


if __name__ == "__main__":
    B, N, D = 2, 8, 32
    key = jax.random.PRNGKey(0)
    kx, kw, kb = jax.random.split(key, 3)

    x = jax.random.normal(kx, (B, N, D), dtype=jnp.float32)

    # LayerNorm params: PyTorch default init (weight=1, bias=0).
    gamma = jnp.ones((D,), dtype=jnp.float32)
    beta = jnp.zeros((D,), dtype=jnp.float32)

    # fn = Linear(D, D), deterministic init in-script.
    w = jax.random.normal(kw, (D, D), dtype=jnp.float32) / jnp.sqrt(D)
    b = jax.random.normal(kb, (D,), dtype=jnp.float32) * 0.01

    ref = reference(x, gamma, beta, w, b)

    # 1) resident-W path, exact f32 matmul.
    out_f32 = jax.block_until_ready(
        prenorm_linear(x, gamma, beta, w, b, allow_bf16_matmul=False))
    assert out_f32.shape == (B, N, D)
    assert jnp.allclose(out_f32, ref, atol=5e-3, rtol=5e-3), "f32 path mismatch"

    # 2) resident-W path, default bf16 MXU matmul (f32 accumulation).
    out_bf16 = jax.block_until_ready(prenorm_linear(x, gamma, beta, w, b))
    assert out_bf16.shape == (B, N, D)
    assert jnp.allclose(out_bf16, ref, atol=5e-2, rtol=5e-2), "bf16 path mismatch"

    # 3) column-tiled fallback path (exercised explicitly for coverage).
    out_ct = jax.block_until_ready(
        prenorm_linear(x, gamma, beta, w, b, allow_bf16_matmul=False,
                       _force_column_tiled=True))
    assert out_ct.shape == (B, N, D)
    assert jnp.allclose(out_ct, ref, atol=5e-3, rtol=5e-3), "tiled path mismatch"

    print("KERNEL_OK")
</pallas_src>

<mosaic_0001>
module attributes {stable_mosaic.version = 11 : i64} {
  func.func @_prenorm_resident_kernel(%arg0: i32, %arg1: memref<8x128xf32, #tpu.memory_space<vmem>>, %arg2: memref<1x128xf32, #tpu.memory_space<vmem>>, %arg3: memref<1x128xf32, #tpu.memory_space<vmem>>, %arg4: memref<128x32xf32, #tpu.memory_space<vmem>>, %arg5: memref<1x32xf32, #tpu.memory_space<vmem>>, %arg6: memref<8x32xf32, #tpu.memory_space<vmem>>) attributes {dimension_semantics = [#tpu.dimension_semantics<parallel>], iteration_bounds = array<i64: 2>, scalar_prefetch = 0 : i64, scratch_operands = 0 : i64, tpu.core_type = #tpu.core_type<tc>, window_params = [{transform_indices = @transform_0, window_bounds = array<i64: 8, 128>}, {pipeline_mode = #tpu.pipeline_mode<synchronous>, transform_indices = @transform_1, window_bounds = array<i64: 1, 128>}, {pipeline_mode = #tpu.pipeline_mode<synchronous>, transform_indices = @transform_2, window_bounds = array<i64: 1, 128>}, {pipeline_mode = #tpu.pipeline_mode<synchronous>, transform_indices = @transform_3, window_bounds = array<i64: 128, 32>}, {pipeline_mode = #tpu.pipeline_mode<synchronous>, transform_indices = @transform_4, window_bounds = array<i64: 1, 32>}, {transform_indices = @transform_5, window_bounds = array<i64: 8, 32>}]} {
    %c0 = arith.constant 0 : index
    %c0_0 = arith.constant 0 : index
    %0 = vector.load %arg1[%c0, %c0_0] : memref<8x128xf32, #tpu.memory_space<vmem>>, vector<8x128xf32>
    %cst = arith.constant dense<0.000000e+00> : vector<8xf32>
    %1 = vector.multi_reduction <add>, %0, %cst [1] : vector<8x128xf32> to vector<8xf32>
    %2 = vector.shape_cast %1 : vector<8xf32> to vector<8x1xf32>
    %cst_1 = arith.constant 3.125000e-02 : f32
    %3 = vector.broadcast %cst_1 : f32 to vector<8x1xf32>
    %4 = arith.mulf %2, %3 : vector<8x1xf32>
    %5 = arith.mulf %0, %0 : vector<8x128xf32>
    %cst_2 = arith.constant dense<0.000000e+00> : vector<8xf32>
    %6 = vector.multi_reduction <add>, %5, %cst_2 [1] : vector<8x128xf32> to vector<8xf32>
    %7 = vector.shape_cast %6 : vector<8xf32> to vector<8x1xf32>
    %cst_3 = arith.constant 3.125000e-02 : f32
    %8 = vector.broadcast %cst_3 : f32 to vector<8x1xf32>
    %9 = arith.mulf %7, %8 : vector<8x1xf32>
    %10 = arith.mulf %4, %4 : vector<8x1xf32>
    %11 = arith.subf %9, %10 : vector<8x1xf32>
    %cst_4 = arith.constant 0.000000e+00 : f32
    %12 = vector.broadcast %cst_4 : f32 to vector<8x1xf32>
    %13 = arith.maximumf %11, %12 : vector<8x1xf32>
    %14 = vector.broadcast %4 : vector<8x1xf32> to vector<8x128xf32>
    %15 = arith.subf %0, %14 : vector<8x128xf32>
    %cst_5 = arith.constant 9.99999974E-6 : f32
    %16 = vector.broadcast %cst_5 : f32 to vector<8x1xf32>
    %17 = arith.addf %13, %16 : vector<8x1xf32>
    %18 = math.rsqrt %17 : vector<8x1xf32>
    %19 = vector.broadcast %18 : vector<8x1xf32> to vector<8x128xf32>
    %20 = arith.mulf %15, %19 : vector<8x128xf32>
    %c0_6 = arith.constant 0 : index
    %c0_7 = arith.constant 0 : index
    %21 = vector.load %arg2[%c0_6, %c0_7] : memref<1x128xf32, #tpu.memory_space<vmem>>, vector<1x128xf32>
    %22 = vector.broadcast %21 : vector<1x128xf32> to vector<8x128xf32>
    %23 = arith.mulf %20, %22 : vector<8x128xf32>
    %c0_8 = arith.constant 0 : index
    %c0_9 = arith.constant 0 : index
    %24 = vector.load %arg3[%c0_8, %c0_9] : memref<1x128xf32, #tpu.memory_space<vmem>>, vector<1x128xf32>
    %25 = vector.broadcast %24 : vector<1x128xf32> to vector<8x128xf32>
    %26 = arith.addf %23, %25 : vector<8x128xf32>
    %c0_10 = arith.constant 0 : index
    %c0_11 = arith.constant 0 : index
    %27 = vector.load %arg4[%c0_10, %c0_11] : memref<128x32xf32, #tpu.memory_space<vmem>>, vector<128x32xf32>
    %cst_12 = arith.constant dense<0.000000e+00> : vector<8x32xf32>
    %28 = tpu.matmul %26, %27, %cst_12 {dimension_numbers = #tpu.dot_dimension_numbers<[1], [0], [0], [1], [0, 0, 1, 1], [], []>} : vector<8x128xf32>, vector<128x32xf32>, vector<8x32xf32> -> vector<8x32xf32>
    %c0_13 = arith.constant 0 : index
    %c0_14 = arith.constant 0 : index
    %29 = vector.load %arg5[%c0_13, %c0_14] : memref<1x32xf32, #tpu.memory_space<vmem>>, vector<1x32xf32>
    %30 = vector.broadcast %29 : vector<1x32xf32> to vector<8x32xf32>
    %31 = arith.addf %28, %30 : vector<8x32xf32>
    %c0_15 = arith.constant 0 : index
    %c0_16 = arith.constant 0 : index
    %32 = vector.load %arg6[%c0_15, %c0_16] : memref<8x32xf32, #tpu.memory_space<vmem>>, vector<8x32xf32>
    tpu.vector_store %arg6[%c0_15, %c0_16], %31 {strides = array<i32>} : memref<8x32xf32, #tpu.memory_space<vmem>>, vector<8x32xf32>,
    return
  }
  func.func @transform_0(%arg0: i32) -> (i32, i32) {
    %c0_i32 = arith.constant 0 : i32
    %c0_i32_0 = arith.constant 0 : i32
    return %arg0, %c0_i32 : i32, i32
  }
  func.func @transform_1(%arg0: i32) -> (i32, i32) {
    %c0_i32 = arith.constant 0 : i32
    %c0_i32_0 = arith.constant 0 : i32
    %c0_i32_1 = arith.constant 0 : i32
    return %c0_i32, %c0_i32_0 : i32, i32
  }
  func.func @transform_2(%arg0: i32) -> (i32, i32) {
    %c0_i32 = arith.constant 0 : i32
    %c0_i32_0 = arith.constant 0 : i32
    %c0_i32_1 = arith.constant 0 : i32
    return %c0_i32, %c0_i32_0 : i32, i32
  }
  func.func @transform_3(%arg0: i32) -> (i32, i32) {
    %c0_i32 = arith.constant 0 : i32
    %c0_i32_0 = arith.constant 0 : i32
    %c0_i32_1 = arith.constant 0 : i32
    return %c0_i32, %c0_i32_0 : i32, i32
  }
  func.func @transform_4(%arg0: i32) -> (i32, i32) {
    %c0_i32 = arith.constant 0 : i32
    %c0_i32_0 = arith.constant 0 : i32
    %c0_i32_1 = arith.constant 0 : i32
    return %c0_i32, %c0_i32_0 : i32, i32
  }
  func.func @transform_5(%arg0: i32) -> (i32, i32) {
    %c0_i32 = arith.constant 0 : i32
    %c0_i32_0 = arith.constant 0 : i32
    return %arg0, %c0_i32 : i32, i32
  }
}

</mosaic_0001>

<bundles_post_ra>
// kernel: tpu_custom_call.1
= control target key start
LH: loop header
LB: loop body
LE: loop exit
PB: predicated region body
PF: predicated region fallthrough
CT: control target
= control target key end

     0   :  { %10 = vsyncpa [#allocation3], 0  ;;  %s807_s0 = inlined_call_operand.vmem [shape: f32[16,128], index: 0, kind: input, shape index: {}]   ;;  %s808_s1 = inlined_call_operand.vmem [shape: f32[1,128], index: 1, kind: input, shape index: {}]   ;;  %s809_s2 = inlined_call_operand.vmem [shape: f32[1,128], index: 2, kind: input, shape index: {}]   ;;  %s810_s3 = inlined_call_operand.vmem [shape: f32[128,32], index: 3, kind: input, shape index: {}]   ;;  %s811_s4 = inlined_call_operand.vmem [shape: f32[1,32], index: 4, kind: input, shape index: {}]   ;;  %s812_s5 = inlined_call_operand.hbm [shape: f32[16,32], index: 5, kind: output, shape index: {}]  }
   0x1   :  { %12 = vsyncpa [#allocation3 + $0x1], 0  ;;  %s650_s18 = smov 0   ;;  %s652_s19 = smov 0  }
   0x2   :  { %s654_s20 = smov 0   ;;  %s656_s21 = smov 0  }
   0x3 LB: > { %s671_s22 = sadd.s32 4294967295, %s614_s21   ;;  %s419_s23 = sadd.s32 4294967294, %s614_s21   ;;  %s614_s21 = sphi %s656_s21, %s818_s21   ;;  %s610_s20 = sphi %s654_s20, %s817_s20   ;;  %s606_s19 = sphi %s652_s19, %s816_s19   ;;  %s602_s18 = sphi %s650_s18, %s815_s18  }
   0x4   : > { %s675_s24 = sadd.s32 1, %s614_s21   ;;  %s135_s25 = sadd.s32 1, %s610_s20 }
   0x5   : > { %s132_s26 = ssub.s32 %s614_s21, %s675_s24  ;;  %p145_p0 = scmp.ne.s32.totalorder %s610_s20, %s606_s19 }
   0x6   : > { %p133_p1 = scmp.eq.s32.totalorder %s132_s26, 0  ;;  %p146_p2 = scmp.eq.s32.totalorder %s671_s22, 1 }
   0x7   : > { %p151_p3 = scmp.ne.s32.totalorder %s606_s19, %s602_s18  ;;  %p152_p4 = scmp.eq.s32.totalorder %s419_s23, 1 }
   0x8   : > { %s686_s27 = scalar_select %p133_p1, %s610_s20, %s135_s25  }
   0x9   : > { %p688_p5 = por %p146_p2, %p145_p0  ;;  %p692_p6 = por %p152_p4, %p151_p3 }
   0xa   : > { %p422_p7 = scmp.ge.s32.totalorder %s614_s21, 1  ;;  %p189_p8 = scmp.lt.s32.totalorder %s614_s21, 3 }
   0xc   : > { %p190_p9 = pnand %p422_p7, %p189_p8 }
   0xd   : > { %p216_p10 = scmp.lt.s32.totalorder (!%p190_p9), %s671_s22, 1  ;;  %v251_v0 = vld [vmem:[%s810_s3] sm:$0xff] (!%p190_p9)  ;;  %v252_v1 = vld [vmem:[%s810_s3 + $0x8] sm:$0xff] (!%p190_p9)  ;;  %v616_v2 = vmov (!%p190_p9), 0.0|0.0   ;;  %v253_v6 = vld [vmem:[%s810_s3 + $0x10] sm:$0xff] (!%p190_p9)  ;;  %vm617_vm0 = vmmov (!%p190_p9), 0  }
   0xe   : > { %193 = sbr.rel (%p190_p9) target bundleno = 425 (0x1a9), region = 40  ;;  %484 = vmatprep.subr.bf16.mxu0 (!%p190_p9), %v616_v2  ;;  %v485_v3 = vpack.c.bf16 (!%p190_p9), %v252_v1, %v251_v0  ;;  %v254_v7 = vld [vmem:[%s810_s3 + $0x18] sm:$0xff] (!%p190_p9)  ;;  %v255_v9 = vld [vmem:[%s810_s3 + $0x20] sm:$0xff] (!%p190_p9)  ;;  %v256_v10 = vld [vmem:[%s810_s3 + $0x28] sm:$0xff] (!%p190_p9)  ;;  %v618_v20 = vmov (!%p190_p9), 0.0   ;;  %s213_s14 = sand.u32 (!%p190_p9), 1, %s606_s19  }
   0xf   : > { %v488_v8 = vpack.c.bf16 (!%p190_p9), %v254_v7, %v253_v6  ;;  %v491_v11 = vpack.c.bf16 (!%p190_p9), %v256_v10, %v255_v9  ;;  %v257_v12 = vld [vmem:[%s810_s3 + $0x30] sm:$0xff] (!%p190_p9)  ;;  %v258_v13 = vld [vmem:[%s810_s3 + $0x38] sm:$0xff] (!%p190_p9)  ;;  %v259_v15 = vld [vmem:[%s810_s3 + $0x40] sm:$0xff] (!%p190_p9)  ;;  %481 = vmatprep.mubr.msk.f32.mxu0 (!%p190_p9), %vm617_vm0, %v618_v20  ;;  %s423_s15 = sshll.u32 (!%p190_p9), %s213_s14, 3  ;;  %s429_s23 = sshll.u32 (!%p190_p9), %s671_s22, 7  ;;  %vm344_vm1 = vcmask (!%p190_p9), 261120  }
  0x10   : > { %486 = vmatpush3.bf16.msra.mxu0 (!%p190_p9), %v485_v3  ;;  %v494_v14 = vpack.c.bf16 (!%p190_p9), %v258_v13, %v257_v12  ;;  %v260_v16 = vld [vmem:[%s810_s3 + $0x48] sm:$0xff] (!%p190_p9)  ;;  %v261_v18 = vld [vmem:[%s810_s3 + $0x50] sm:$0xff] (!%p190_p9)  ;;  %v262_v19 = vld [vmem:[%s810_s3 + $0x58] sm:$0xff] (!%p190_p9)  ;;  %s215_s25 = scalar_lea.vmem (!%p190_p9), [#allocation2], %s423_s15  ;;  %s765_s7 = scalar_lea.hbm (!%p190_p9), %s812_s5, %s429_s23 }
  0x11   : > { %487 = vmatprep.subr.bf16.mxu0 (!%p190_p9), %v616_v2  ;;  %v497_v17 = vpack.c.bf16 (!%p190_p9), %v260_v16, %v259_v15  ;;  %v500_v21 = vpack.c.bf16 (!%p190_p9), %v262_v19, %v261_v18  ;;  %v263_v22 = vld [vmem:[%s810_s3 + $0x60] sm:$0xff] (!%p190_p9)  ;;  %v264_v23 = vld [vmem:[%s810_s3 + $0x68] sm:$0xff] (!%p190_p9)  ;;  %v265_v25 = vld [vmem:[%s810_s3 + $0x70] sm:$0xff] (!%p190_p9)  ;;  %s360_s26 = sshll.u32 (!%p190_p9), %s215_s25, 4  ;;  %s347_s8 = scalar_lea.sflag (!%p190_p9), [#allocation3], %s213_s14  ;;  %s767_s26 = int_to_ptr.vmem [resolvable:$true] %s360_s26 }
  0x12   : > { %v503_v24 = vpack.c.bf16 (!%p190_p9), %v264_v23, %v263_v22  ;;  %v266_v26 = vld [vmem:[%s810_s3 + $0x78] sm:$0xff] (!%p190_p9)  ;;  %v425_v38 = vld [vmem:[%s808_s1] ss:$0 sm:$0xff] (!%p190_p9) }
  0x13   : > { %v506_v27 = vpack.c.bf16 (!%p190_p9), %v266_v26, %v265_v25  ;;  %v426_v40 = vld [vmem:[%s809_s2] ss:$0 sm:$0xff] (!%p190_p9) }
  0x14   : > { %489 = vmatpush3.bf16.msra.mxu0 (!%p190_p9), %v488_v8  ;;  %v427_v43 = vld [vmem:[%s811_s4] ss:$0 sm:$0xff] (!%p190_p9) }
  0x15   : > { %s217_s9 = scalar_select %p216_p10, %s671_s22, 1  ;;  %490 = vmatprep.subr.bf16.mxu0 %v616_v2 }
  0x16   : > { %s619_s22 = smov [#allocation2]  }
  0x17   : > { %s424_s10 = sshll.u32 %s217_s9, 3  ;;  %s552_s9 = scalar_lea.vmem %s767_s26, 128 }
  0x18   : > { %s219_s13 = scalar_lea.vmem %s807_s0, %s424_s10  ;;  %492 = vmatpush3.bf16.msra.mxu0 %v491_v11  ;;  %p553_p11 = scmp.ne.s32.totalorder %s767_s26, %s552_s9 }
  0x19   : > { %v220_v4 = vld [vmem:[%s219_s13] sm:$0xff]  ;;  %493 = vmatprep.subr.bf16.mxu0 %v616_v2  ;;  %s556_s10 = sshll.u32 %s619_s22, 4  ;;  %s557_s10 = int_to_ptr.vmem [resolvable:$false] %s556_s10 }
  0x1a   : > { %221 = vadd.xlane.f32.xlu0 %v220_v4  ;;  %v224_v5 = vmul.f32 %v220_v4, %v220_v4  ;;  %p554_p12 = pnand %p553_p11, %p688_p5  ;;  %s558_s11 = scalar_lea.vmem %s557_s10, 256 }
  0x1b   : > { %p559_p0 = scmp.lt.s32.totalorder %s767_s26, %s557_s10  ;;  %p560_p1 = scmp.lt.s32.totalorder %s558_s11, %s552_s9 }
  0x1c   : > { %495 = vmatpush3.bf16.msra.mxu0 %v494_v14  ;;  %p555_p13 = pneg %p554_p12 }
  0x1d   : > { %496 = vmatprep.subr.bf16.mxu0 %v616_v2  ;;  %p561_p2 = por %p560_p1, %p559_p0 }
  0x1e   : > { %225 = vadd.xlane.f32.xlu0 %v224_v5 }
  0x1f   : > { %p562_p3 = pnand %p561_p2, %p555_p13 }
  0x20   : > { %498 = vmatpush3.bf16.msra.mxu0 %v497_v17 }
  0x21   : > { %499 = vmatprep.subr.bf16.mxu0 %v616_v2 }
  0x24   : > { %501 = vmatpush3.bf16.msra.mxu0 %v500_v21 }
  0x25   : > { %502 = vmatprep.subr.bf16.mxu0 %v616_v2 }
  0x28   : > { %504 = vmatpush3.bf16.msra.mxu0 %v503_v24 }
  0x29   : > { %505 = vmatprep.subr.bf16.mxu0 %v616_v2 }
  0x2c   : > { %507 = vmatpush3.bf16.msra.mxu0 %v506_v27 }
  0xa7   : > { %v222_v28 = vpop.xlane.xlu0 %221 }
  0xa8   : > { %v223_v29 = vmul.f32 0.03125, %v222_v28 }
  0xaa   : > { %v228_v31 = vmul.f32 %v223_v29, %v223_v29  ;;  %v231_v36 = vsub.f32 %v220_v4, %v223_v29 }
  0xab   : > { %v226_v30 = vpop.xlane.xlu0 %225 }
  0xac   : > { %v227_v32 = vmul.f32 0.03125, %v226_v30 }
  0xae   : > { %v229_v33 = vsub.f32 %v227_v32, %v228_v31 }
  0xb0   : > { %v230_v34 = vmax.f32 %v229_v33, 0.0 }
  0xb2   : > { %v232_v35 = vadd.f32 1e-05, %v230_v34 }
  0xb4   : > { %550 = vrsqrt.f32 %v232_v35 }
  0xbe   : > { %v551_v37 = vpop.eup %550 }
  0xbf   : > { %v234_v39 = vmul.f32 %v551_v37, %v231_v36 }
  0xc1   : > { %v242_v41 = vmul.f32 %v425_v38, %v234_v39 }
  0xc3   : > { %v250_v42 = vadd.f32 %v426_v40, %v242_v41 }
  0xc5   : > { %482 = vmatmul.mubr.f32.vlgmr.msra.gmra.mrb[0].mxu0 %v250_v42 }
 0x198   : > { %v340_v44 = vpop.f32.mrb[0].mxu0 }
 0x199   : > { %v341_v45 = vadd.f32 %v427_v43, %v340_v44  ;;  %v483_v46 = vpop.f32.mrb[1].mxu0 }
 0x19b   : > { %345 = vst.msk [vmem:[%s215_s25] sm:$0xff] %vm344_vm1, %v341_v45 }
 0x19c   : > { %565 = shalt.err (!%p562_p3)
}
 0x19d   : > { %s566_s12 = scalar_lea.hbm %s765_s7, 128  ;;  %s570_s15 = scalar_lea.hbm %s812_s5, 256 }
 0x19e   : > { %p567_p4 = scmp.ne.s32.totalorder %s765_s7, %s566_s12  ;;  %p571_p9 = scmp.lt.u32.totalorder %s765_s7, %s812_s5 }
 0x19f   : > { %p572_p10 = scmp.lt.u32.totalorder %s570_s15, %s566_s12  ;;  %p574_p12 = scmp.lt.u32.totalorder %s566_s12, %s765_s7 }
 0x1a0   : > { %p568_p7 = pnand %p567_p4, %p688_p5 }
 0x1a1   : > { %p573_p11 = por %p572_p10, %p571_p9 }
 0x1a2   : > { %p569_p8 = pneg %p568_p7 }
 0x1a3   : > { %p575_p13 = por %p574_p12, %p573_p11 }
 0x1a5   : > { %p576_p0 = pnand %p575_p13, %p569_p8 }
 0x1a7   : > { %579 = shalt.err (!%p576_p0)
}
 0x1a8   : > { %508 = dma.vmem_to_hbm [thread:$0]  (%p688_p5), %s767_s26, 128, %s765_s7, %s347_s8  }
 0x1a9 PF: > { %p514_p1 = scmp.ge.s32.totalorder %s614_s21, 2  ;;  %s372_s23 = sand.u32 1, %s602_s18  }
 0x1aa   : > { %s373_s25 = scalar_lea.sflag [#allocation3], %s372_s23 }
 0x1ab   : > { %p511_p2 = pnand %p514_p1, %p692_p6 }
 0x1ad   : > { %597 = dma.done.wait (!%p511_p2), %s373_s25, 128  }
 0x1ae   : > { %599 = vsyncadd (!%p511_p2), %s373_s25, 4294967168  ;;  %p15_p3 = scmp.ge.s32.totalorder %s675_s24, 4   ;;  %s815_s18 = smov %s606_s19 }
 0x1af   : > { %s816_s19 = smov %s610_s20  ;;  %s817_s20 = smov %s686_s27 }
 0x1b0   : > { %s818_s21 = smov %s675_s24  ;;  %17 = sbr.rel (!%p15_p3) target bundleno = 3 (0x3), region = 75 }
 0x1b7   :  { %378 = vsyncpa [#allocation3], 1 }
 0x1b8   :  { %380 = vsyncpa [#allocation3 + $0x1], 1 }

</bundles_post_ra>
